<compile_context>
chip_gen: v6e
topology: v6e:2x2x1
jax: 0.10.0
libtpu: 0.0.40
codegen_flags: <defaults>
</compile_context>

<pallas_src>
import functools

import jax
import jax.numpy as jnp
from jax.experimental import pallas as pl
from jax.experimental.pallas import tpu as pltpu

_N_PAD = 8  # output width 3 padded to 8 (kept narrow on purpose: output is tiny)


def _linear_kernel(x_ref, w_ref, o_ref, *, kdim, tk, mask_k):
    # x_ref: (TB, TK)   w_ref: (TK, N_PAD)   o_ref: (TB, N_PAD) f32 accumulator
    k = pl.program_id(1)

    @pl.when(k == 0)
    def _():
        o_ref[...] = jnp.zeros_like(o_ref)

    x = x_ref[...]
    if mask_k:
        # Last K block is partial: OOB columns hold unspecified data. Zero them
        # (cheap VPU work, fully hidden under the HBM-bound DMA).
        col = jax.lax.broadcasted_iota(jnp.int32, x.shape, 1) + k * tk
        x = jnp.where(col < kdim, x, 0.0)

    o_ref[...] += jnp.dot(x, w_ref[...], preferred_element_type=jnp.float32)


def _round_up(v, m):
    return ((v + m - 1) // m) * m


def para_decoder_triplet(x, weight, bias, *, tb=512, tk=2048):
    """ParaDecoderTriplet forward: y = flatten(x) @ W^T + b.

    x:      (B, S1, S2) float32
    weight: (3, K) float32 (PyTorch nn.Linear layout), K = S1*S2
    bias:   (3,)  float32
    returns (B, 3) float32
    """
    s0, s1, s2 = x.shape
    kdim = s1 * s2
    assert weight.shape == (3, kdim)
    assert bias.shape == (3,)

    x_flat = x.reshape(s0, kdim).astype(jnp.float32)

    # Tile sizes: only respect the (8, 128) layout minimum; never round the
    # problem up to the tile size (no zero streaming).
    tk = max(128, min(_round_up(tk, 128), _round_up(kdim, 128)))
    tb = max(8, min(_round_up(tb, 8), _round_up(s0, 8)))

    b_grid = pl.cdiv(s0, tb)
    # Keep >=2 blocks on the "parallel" batch axis when possible so both v7x
    # TensorCores stream x (harmless on single-TC v5e/v6e).
    if b_grid < 2 and s0 > 8:
        tb = _round_up(pl.cdiv(_round_up(s0, 8), 2), 8)
        b_grid = pl.cdiv(s0, tb)
    k_grid = pl.cdiv(kdim, tk)
    k_pad = k_grid * tk

    # One-time transpose + zero-pad of the tiny weight: (k_pad, 8), so every W
    # block is full and the padded rows contribute exactly 0.
    w_t = jnp.zeros((k_pad, _N_PAD), jnp.float32).at[:kdim, :3].set(
        weight.T.astype(jnp.float32)
    )

    mask_k = (kdim % tk) != 0  # static: only mask when the last K block is ragged

    kernel = functools.partial(_linear_kernel, kdim=kdim, tk=tk, mask_k=mask_k)

    out = pl.pallas_call(
        kernel,
        out_shape=jax.ShapeDtypeStruct((s0, _N_PAD), jnp.float32),
        grid_spec=pltpu.PrefetchScalarGridSpec(
            num_scalar_prefetch=0,
            grid=(b_grid, k_grid),
            in_specs=[
                pl.BlockSpec((tb, tk), lambda i, k: (i, k)),
                pl.BlockSpec((tk, _N_PAD), lambda i, k: (k, 0)),
            ],
            out_specs=pl.BlockSpec((tb, _N_PAD), lambda i, k: (i, 0)),
        ),
        compiler_params=pltpu.CompilerParams(
            dimension_semantics=("parallel", "arbitrary"),
        ),
        cost_estimate=pl.CostEstimate(
            flops=2 * s0 * kdim * 3,
            # actual streamed bytes: x once, W once per batch tile, out once
            bytes_accessed=4 * (s0 * kdim + b_grid * k_pad * _N_PAD + s0 * _N_PAD),
            transcendentals=0,
        ),
    )(x_flat, w_t)

    # Bias folded on the tiny (B, 3) result (cheaper than a per-tile VPU pass).
    return out[:, :3] + bias.astype(jnp.float32)


def init_params(key, input_size):
    # Deterministic init mimicking nn.Linear default: U(-1/sqrt(K), 1/sqrt(K))
    kw, kb = jax.random.split(key)
    bound = 1.0 / jnp.sqrt(jnp.float32(input_size))
    weight = jax.random.uniform(kw, (3, input_size), jnp.float32, -bound, bound)
    bias = jax.random.uniform(kb, (3,), jnp.float32, -bound, bound)
    return weight, bias


def _check(x, weight, bias, atol=1e-4, rtol=1e-5, **kw):
    y = jax.block_until_ready(para_decoder_triplet(x, weight, bias, **kw))
    b, s1, s2 = x.shape
    y_ref = x.reshape(b, s1 * s2) @ weight.T + bias
    assert y.shape == (b, 3), y.shape
    assert jnp.allclose(y, y_ref, atol=atol, rtol=rtol), (
        float(jnp.max(jnp.abs(y - y_ref)))
    )


if __name__ == "__main__":
    key = jax.random.PRNGKey(0)
    k1, k2, k3, k4 = jax.random.split(key, 4)

    # Case 1: unaligned shapes (B=12, K=300) -> partial B block + masked K tail.
    B1, S1a, S2a = 12, 10, 30
    x1 = jax.random.normal(k1, (B1, S1a, S2a), jnp.float32)
    w1, b1 = init_params(k2, S1a * S2a)
    _check(x1, w1, b1)                       # single K block, masked tail
    _check(x1, w1, b1, tk=128)               # 3 K blocks, last one masked

    # Case 2: aligned K=768 (B=16) -> no masking; also exercise multi-K accumulation.
    B2, S1b, S2b = 16, 16, 48
    x2 = jax.random.normal(k3, (B2, S1b, S2b), jnp.float32)
    w2, b2 = init_params(k4, S1b * S2b)
    _check(x2, w2, b2)                       # single full K block
    _check(x2, w2, b2, tk=256)               # 3 full K blocks, accumulator path

    print("KERNEL_OK")
</pallas_src>

<mosaic_0001>
module attributes {stable_mosaic.version = 11 : i64} {
  func.func @_linear_kernel(%arg0: i32, %arg1: i32, %arg2: memref<8x384xf32, #tpu.memory_space<vmem>>, %arg3: memref<384x8xf32, #tpu.memory_space<vmem>>, %arg4: memref<8x8xf32, #tpu.memory_space<vmem>>) attributes {dimension_semantics = [#tpu.dimension_semantics<parallel>, #tpu.dimension_semantics<arbitrary>], iteration_bounds = array<i64: 2, 1>, scalar_prefetch = 0 : i64, scratch_operands = 0 : i64, tpu.core_type = #tpu.core_type<tc>, window_params = [{transform_indices = @transform_0, window_bounds = array<i64: 8, 384>}, {transform_indices = @transform_1, window_bounds = array<i64: 384, 8>}, {transform_indices = @transform_2, window_bounds = array<i64: 8, 8>}]} {
    %c0_i32 = arith.constant 0 : i32
    %0 = arith.cmpi eq, %arg1, %c0_i32 : i32
    %1 = arith.extui %0 : i1 to i32
    %c0_i32_0 = arith.constant 0 : i32
    %2 = arith.cmpi ne, %1, %c0_i32_0 : i32
    scf.if %2 {
      %cst_9 = arith.constant 0.000000e+00 : f32
      %17 = vector.broadcast %cst_9 : f32 to vector<8x8xf32>
      %c0_10 = arith.constant 0 : index
      %c0_11 = arith.constant 0 : index
      %18 = vector.load %arg4[%c0_10, %c0_11] : memref<8x8xf32, #tpu.memory_space<vmem>>, vector<8x8xf32>
      tpu.vector_store %arg4[%c0_10, %c0_11], %17 {strides = array<i32>} : memref<8x8xf32, #tpu.memory_space<vmem>>, vector<8x8xf32>,
    } else {
    }
    %c0 = arith.constant 0 : index
    %c0_1 = arith.constant 0 : index
    %3 = vector.load %arg2[%c0, %c0_1] : memref<8x384xf32, #tpu.memory_space<vmem>>, vector<8x384xf32>
    %4 = tpu.iota {dimensions = array<i32: 1>} : vector<8x384xi32>
    %c384_i32 = arith.constant 384 : i32
    %5 = arith.muli %arg1, %c384_i32 : i32
    %6 = vector.broadcast %5 : i32 to vector<8x384xi32>
    %7 = arith.addi %4, %6 : vector<8x384xi32>
    %c300_i32 = arith.constant 300 : i32
    %8 = vector.broadcast %c300_i32 : i32 to vector<8x384xi32>
    %9 = arith.cmpi slt, %7, %8 : vector<8x384xi32>
    %cst = arith.constant 0.000000e+00 : f32
    %10 = vector.broadcast %cst : f32 to vector<8x384xf32>
    %11 = arith.select %9, %3, %10 : vector<8x384xi1>, vector<8x384xf32>
    %c0_2 = arith.constant 0 : index
    %c0_3 = arith.constant 0 : index
    %12 = vector.load %arg4[%c0_2, %c0_3] : memref<8x8xf32, #tpu.memory_space<vmem>>, vector<8x8xf32>
    %c0_4 = arith.constant 0 : index
    %c0_5 = arith.constant 0 : index
    %13 = vector.load %arg3[%c0_4, %c0_5] : memref<384x8xf32, #tpu.memory_space<vmem>>, vector<384x8xf32>
    %cst_6 = arith.constant dense<0.000000e+00> : vector<8x8xf32>
    %14 = tpu.matmul %11, %13, %cst_6 {dimension_numbers = #tpu.dot_dimension_numbers<[1], [0], [0], [1], [0, 0, 1, 1], [], []>} : vector<8x384xf32>, vector<384x8xf32>, vector<8x8xf32> -> vector<8x8xf32>
    %15 = arith.addf %12, %14 : vector<8x8xf32>
    %c0_7 = arith.constant 0 : index
    %c0_8 = arith.constant 0 : index
    %16 = vector.load %arg4[%c0_7, %c0_8] : memref<8x8xf32, #tpu.memory_space<vmem>>, vector<8x8xf32>
    tpu.vector_store %arg4[%c0_7, %c0_8], %15 {strides = array<i32>} : memref<8x8xf32, #tpu.memory_space<vmem>>, vector<8x8xf32>,
    return
  }
  func.func @transform_0(%arg0: i32, %arg1: i32) -> (i32, i32) {
    %c0_i32 = arith.constant 0 : i32
    return %arg0, %arg1 : i32, i32
  }
  func.func @transform_1(%arg0: i32, %arg1: i32) -> (i32, i32) {
    %c0_i32 = arith.constant 0 : i32
    %c0_i32_0 = arith.constant 0 : i32
    return %arg1, %c0_i32 : i32, i32
  }
  func.func @transform_2(%arg0: i32, %arg1: i32) -> (i32, i32) {
    %c0_i32 = arith.constant 0 : i32
    %c0_i32_0 = arith.constant 0 : i32
    return %arg0, %c0_i32 : i32, i32
  }
}

</mosaic_0001>

<bundles_post_ra>
// kernel: tpu_custom_call.1
= control target key start
LH: loop header
LB: loop body
LE: loop exit
PB: predicated region body
PF: predicated region fallthrough
CT: control target
= control target key end

     0   :  { %s657_s9 = smov 0   ;;  %s659_s10 = smov 0   ;;  %s862_s0 = inlined_call_operand.vmem [shape: f32[12,300], index: 0, kind: input, shape index: {}]   ;;  %s863_s1 = inlined_call_operand.vmem [shape: f32[384,8], index: 1, kind: input, shape index: {}]   ;;  %s864_s2 = inlined_call_operand.vmem [shape: f32[12,8], index: 2, kind: output, shape index: {}]  }
   0x1   :  { %s661_s11 = smov 0  }
   0x2 LB: > { %s24_s12 = sadd.s32 1, %s634_s10  ;;  %p496_p0 = scmp.ge.s32.totalorder %s638_s11, 1  ;;  %s638_s11 = sphi %s661_s11, %s12_s11   ;;  %s634_s10 = sphi %s659_s10, %s866_s10   ;;  %s630_s9 = sphi %s657_s9, %s865_s9  }
   0x3   : > { %p26_p1 = scmp.ge.s32.totalorder %s24_s12, 2  ;;  %p142_p2 = scmp.lt.s32.totalorder %s638_s11, 3 }
   0x5   : > { %s868_s12 = smov (%p26_p1, %s24_s12), 0  ;;  %p143_p3 = pnand %p496_p0, %p142_p2 }
   0x6   : > { %p173_p4 = scmp.lt.s32.totalorder (!%p143_p3), %s630_s9, 1 }
   0x7   : > { %146 = sbr.rel (%p143_p3) target bundleno = 247 (0xf7), region = 28 }
   0xc   : > { %v248_v0 = vld [vmem:[%s863_s1 + $0xf8] sm:$0xff]  ;;  %v247_v2 = vld [vmem:[%s863_s1 + $0xf0] sm:$0xff]  ;;  %v640_v3 = vmov 0.0   ;;  %v246_v6 = vld [vmem:[%s863_s1 + $0xe8] sm:$0xff]  ;;  %s870_s9 = smov (!%p173_p4, %s630_s9), 1  ;;  %v201_v35 = vlaneseq  ;;  %vm641_vm1 = vmmov 0  }
   0xd   : > { %v232_v1 = vld [vmem:[%s863_s1 + $0x78] sm:$0xff]  ;;  %502 = vmatprep.subr.mxu0 %v248_v0  ;;  %554 = vmatprep.subr.mxu1 %v640_v3  ;;  %v231_v4 = vld [vmem:[%s863_s1 + $0x70] sm:$0xff]  ;;  %v230_v8 = vld [vmem:[%s863_s1 + $0x68] sm:$0xff]  ;;  %s589_s5 = smul.u32 24, %s870_s9  ;;  %s498_s17 = sshll.u32 %s870_s9, 3  ;;  %vm196_vm2 = vcmask 64512  }
   0xe   : > { %v264_v5 = vld [vmem:[%s863_s1 + $0x178] sm:$0xff]  ;;  %503 = vmatpush3.msra.mxu0 %v232_v1  ;;  %v263_v7 = vld [vmem:[%s863_s1 + $0x170] sm:$0xff]  ;;  %v262_v9 = vld [vmem:[%s863_s1 + $0x168] sm:$0xff]  ;;  %v202_v42 = vand.u32 127, %v201_v35  ;;  %586 = vmatprep.mubr.msk.f32.mxu1 %vm641_vm1, %v640_v3  ;;  %s191_s20 = scalar_lea.vmem %s864_s2, %s498_s17 }
   0xf   : > { %555 = vmatpush3.msra.mxu1 %v264_v5  ;;  %504 = vmatprep.subr.mxu0 %v247_v2  ;;  %v245_v10 = vld [vmem:[%s863_s1 + $0xe0] sm:$0xff]  ;;  %v244_v13 = vld [vmem:[%s863_s1 + $0xd8] sm:$0xff]  ;;  %v243_v16 = vld [vmem:[%s863_s1 + $0xd0] sm:$0xff]  ;;  %s180_s24 = scalar_lea.vmem %s862_s0, %s589_s5  ;;  %197 = vst.msk [vmem:[%s191_s20] sm:$0xff] %vm196_vm2, %v640_v3 }
  0x10   : > { %556 = vmatprep.subr.mxu1 %v640_v3  ;;  %505 = vmatpush3.msra.mxu0 %v231_v4  ;;  %v229_v11 = vld [vmem:[%s863_s1 + $0x60] sm:$0xff]  ;;  %v228_v14 = vld [vmem:[%s863_s1 + $0x58] sm:$0xff]  ;;  %v227_v17 = vld [vmem:[%s863_s1 + $0x50] sm:$0xff]  ;;  %v204_v50 = vadd.s32 256, %v202_v42 }
  0x11   : > { %557 = vmatpush3.msra.mxu1 %v263_v7  ;;  %506 = vmatprep.subr.mxu0 %v246_v6  ;;  %v261_v12 = vld [vmem:[%s863_s1 + $0x160] sm:$0xff]  ;;  %v260_v15 = vld [vmem:[%s863_s1 + $0x158] sm:$0xff]  ;;  %v259_v18 = vld [vmem:[%s863_s1 + $0x150] sm:$0xff] }
  0x12   : > { %558 = vmatprep.subr.mxu1 %v640_v3  ;;  %507 = vmatpush3.msra.mxu0 %v230_v8  ;;  %v242_v19 = vld [vmem:[%s863_s1 + $0xc8] sm:$0xff]  ;;  %v241_v22 = vld [vmem:[%s863_s1 + $0xc0] sm:$0xff]  ;;  %v240_v25 = vld [vmem:[%s863_s1 + $0xb8] sm:$0xff]  ;;  %vm212_vm0 = vcmp.lt.s32.totalorder %v204_v50, 300 }
  0x13   : > { %559 = vmatpush3.msra.mxu1 %v262_v9  ;;  %508 = vmatprep.subr.mxu0 %v245_v10  ;;  %v226_v20 = vld [vmem:[%s863_s1 + $0x48] sm:$0xff]  ;;  %v225_v23 = vld [vmem:[%s863_s1 + $0x40] sm:$0xff]  ;;  %v224_v26 = vld [vmem:[%s863_s1 + $0x38] sm:$0xff] }
  0x14   : > { %560 = vmatprep.subr.mxu1 %v640_v3  ;;  %509 = vmatpush3.msra.mxu0 %v229_v11  ;;  %v258_v21 = vld [vmem:[%s863_s1 + $0x148] sm:$0xff]  ;;  %v257_v24 = vld [vmem:[%s863_s1 + $0x140] sm:$0xff]  ;;  %v256_v27 = vld [vmem:[%s863_s1 + $0x138] sm:$0xff] }
  0x15   : > { %561 = vmatpush3.msra.mxu1 %v261_v12  ;;  %510 = vmatprep.subr.mxu0 %v244_v13  ;;  %v239_v28 = vld [vmem:[%s863_s1 + $0xb0] sm:$0xff]  ;;  %v238_v31 = vld [vmem:[%s863_s1 + $0xa8] sm:$0xff]  ;;  %v237_v34 = vld [vmem:[%s863_s1 + $0xa0] sm:$0xff] }
  0x16   : > { %562 = vmatprep.subr.mxu1 %v640_v3  ;;  %511 = vmatpush3.msra.mxu0 %v228_v14  ;;  %v223_v29 = vld [vmem:[%s863_s1 + $0x30] sm:$0xff]  ;;  %v222_v32 = vld [vmem:[%s863_s1 + $0x28] sm:$0xff]  ;;  %v221_v36 = vld [vmem:[%s863_s1 + $0x20] sm:$0xff] }
  0x17   : > { %563 = vmatpush3.msra.mxu1 %v260_v15  ;;  %512 = vmatprep.subr.mxu0 %v243_v16  ;;  %v255_v30 = vld [vmem:[%s863_s1 + $0x130] sm:$0xff]  ;;  %v254_v33 = vld [vmem:[%s863_s1 + $0x128] sm:$0xff]  ;;  %v253_v37 = vld [vmem:[%s863_s1 + $0x120] sm:$0xff] }
  0x18   : > { %564 = vmatprep.subr.mxu1 %v640_v3  ;;  %513 = vmatpush3.msra.mxu0 %v227_v17  ;;  %v236_v38 = vld [vmem:[%s863_s1 + $0x98] sm:$0xff]  ;;  %v235_v41 = vld [vmem:[%s863_s1 + $0x90] sm:$0xff]  ;;  %v234_v45 = vld [vmem:[%s863_s1 + $0x88] sm:$0xff] }
  0x19   : > { %565 = vmatpush3.msra.mxu1 %v259_v18  ;;  %514 = vmatprep.subr.mxu0 %v242_v19  ;;  %v220_v39 = vld [vmem:[%s863_s1 + $0x18] sm:$0xff]  ;;  %v219_v43 = vld [vmem:[%s863_s1 + $0x10] sm:$0xff]  ;;  %v218_v46 = vld [vmem:[%s863_s1 + $0x8] sm:$0xff] }
  0x1a   : > { %566 = vmatprep.subr.mxu1 %v640_v3  ;;  %515 = vmatpush3.msra.mxu0 %v226_v20  ;;  %v252_v40 = vld [vmem:[%s863_s1 + $0x118] sm:$0xff]  ;;  %v251_v44 = vld [vmem:[%s863_s1 + $0x110] sm:$0xff]  ;;  %v199_v47 = vld [vmem:[%s180_s24 + $0x8] sm:$0xff] }
  0x1b   : > { %567 = vmatpush3.msra.mxu1 %v258_v21  ;;  %516 = vmatprep.subr.mxu0 %v241_v22  ;;  %v233_v48 = vld [vmem:[%s863_s1 + $0x80] sm:$0xff]  ;;  %v250_v49 = vld [vmem:[%s863_s1 + $0x108] sm:$0xff]  ;;  %v200_v54 = vld [vmem:[%s180_s24 + $0x10] sm:$0xff] }
  0x1c   : > { %568 = vmatprep.subr.mxu1 %v640_v3  ;;  %517 = vmatpush3.msra.mxu0 %v225_v23  ;;  %v217_v51 = vld [vmem:[%s863_s1] sm:$0xff] }
  0x1d   : > { %569 = vmatpush3.msra.mxu1 %v257_v24  ;;  %518 = vmatprep.subr.mxu0 %v240_v25  ;;  %v198_v52 = vld [vmem:[%s180_s24] sm:$0xff] }
  0x1e   : > { %570 = vmatprep.subr.mxu1 %v640_v3  ;;  %519 = vmatpush3.msra.mxu0 %v224_v26  ;;  %v249_v53 = vld [vmem:[%s863_s1 + $0x100] sm:$0xff] }
  0x1f   : > { %571 = vmatpush3.msra.mxu1 %v256_v27  ;;  %520 = vmatprep.subr.mxu0 %v239_v28  ;;  %v216_v59 = vld [vmem:[%s191_s20] sm:$0xff] }
  0x20   : > { %572 = vmatprep.subr.mxu1 %v640_v3  ;;  %521 = vmatpush3.msra.mxu0 %v223_v29 }
  0x21   : > { %573 = vmatpush3.msra.mxu1 %v255_v30  ;;  %522 = vmatprep.subr.mxu0 %v238_v31 }
  0x22   : > { %574 = vmatprep.subr.mxu1 %v640_v3  ;;  %523 = vmatpush3.msra.mxu0 %v222_v32 }
  0x23   : > { %575 = vmatpush3.msra.mxu1 %v254_v33  ;;  %524 = vmatprep.subr.mxu0 %v237_v34 }
  0x24   : > { %576 = vmatprep.subr.mxu1 %v640_v3  ;;  %525 = vmatpush3.msra.mxu0 %v221_v36 }
  0x25   : > { %577 = vmatpush3.msra.mxu1 %v253_v37  ;;  %526 = vmatprep.subr.mxu0 %v236_v38 }
  0x26   : > { %578 = vmatprep.subr.mxu1 %v640_v3  ;;  %527 = vmatpush3.msra.mxu0 %v220_v39 }
  0x27   : > { %579 = vmatpush3.msra.mxu1 %v252_v40  ;;  %528 = vmatprep.subr.mxu0 %v235_v41 }
  0x28   : > { %580 = vmatprep.subr.mxu1 %v640_v3  ;;  %529 = vmatpush3.msra.mxu0 %v219_v43 }
  0x29   : > { %581 = vmatpush3.msra.mxu1 %v251_v44  ;;  %530 = vmatprep.subr.mxu0 %v234_v45 }
  0x2a   : > { %582 = vmatprep.subr.mxu1 %v640_v3  ;;  %531 = vmatpush3.msra.mxu0 %v218_v46 }
  0x2b   : > { %329 = vmatprep.mubr.f32.mxu0 %v199_v47  ;;  %532 = vmatprep.subr.mxu0 %v233_v48 }
  0x2c   : > { %583 = vmatpush3.msra.mxu1 %v250_v49  ;;  %533 = vmatpush3.msra.mxu0 %v217_v51 }
  0x2d   : > { %584 = vmatprep.subr.mxu1 %v640_v3  ;;  %330 = vmatmul.mubr.f32.vlgmr.msra.gmra.mxu0 %v198_v52 }
  0x2e   : > { %585 = vmatpush3.msra.mxu1 %v249_v53 }
  0x2f   : > { %587 = vmatmul.mubr.msk.f32.vlgmr.msra.gmra.mxu1 %vm212_vm0, %v200_v54 }
  0xed   : > { %v534_v55 = vpop.f32.mrf.mxu0 }
  0xef   : > { %v535_v56 = vpop.f32.mrf.mxu0  ;;  %v401_v57 = vpop.f32.mrf.mxu1 }
  0xf0   : > { %v536_v58 = vadd.f32 %v535_v56, %v534_v55 }
  0xf1   : > { %v588_v60 = vpop.f32.mrf.mxu1 }
  0xf2   : > { %v402_v61 = vadd.f32 %v536_v58, %v401_v57 }
  0xf4   : > { %v405_v62 = vadd.f32 %v402_v61, %v216_v59 }
  0xf6   : > { %407 = vst.msk [vmem:[%s191_s20] sm:$0xff] %vm196_vm2, %v405_v62 }
  0xf7 PF: > { %s12_s11 = sadd.s32 1, %s638_s11   ;;  %s865_s9 = smov %s634_s10 }
  0xf8   : > { %p9_p5 = scmp.ge.s32.totalorder %s12_s11, 4   ;;  %s866_s10 = smov %s868_s12 }
  0xfa   :  { %11 = sbr.rel (!%p9_p5) target bundleno = 2 (0x2), region = 65 }

</bundles_post_ra>
